<compile_context>
chip_gen: v7x
topology: tpu7x:2x2x1
jax: 0.10.0
libtpu: 0.0.40
codegen_flags: <defaults>
</compile_context>

<pallas_src>
import jax
import jax.numpy as jnp
from jax.experimental import pallas as pl
from jax.experimental.pallas import tpu as pltpu


def _round_up(n, m):
    return ((n + m - 1) // m) * m


def _leaky_relu(x, slope=0.2):
    # max + mul (2 VALU ops) instead of cmp + mul + select (3).
    return jnp.maximum(x, slope * x)


def generator_mlp_kernel(x_ref,
                         w1_ref, b1_ref,
                         w2_ref, b2_ref,
                         w3_ref, b3_ref,
                         w4_ref, b4_ref,
                         out_ref):
    """4-layer MLP on one (TILE_B, feat) batch tile.

    Matmuls run on the MXU in bf16 with f32 accumulation; bias/LeakyReLU are
    f32 VPU work, tanh goes to the EUP, and the result is stored as bf16.
    """
    h = x_ref[...]  # bf16 (TILE_B, 128)

    h = jnp.dot(h, w1_ref[...], preferred_element_type=jnp.float32) + b1_ref[...]
    h = _leaky_relu(h)

    h = jnp.dot(h.astype(jnp.bfloat16), w2_ref[...],
                preferred_element_type=jnp.float32) + b2_ref[...]
    h = _leaky_relu(h)

    h = jnp.dot(h.astype(jnp.bfloat16), w3_ref[...],
                preferred_element_type=jnp.float32) + b3_ref[...]
    h = _leaky_relu(h)

    h = jnp.dot(h.astype(jnp.bfloat16), w4_ref[...],
                preferred_element_type=jnp.float32) + b4_ref[...]
    out_ref[...] = jnp.tanh(h).astype(out_ref.dtype)   # bf16 writeback


def make_generator_params(key, generator_layer_size, z_size, img_shape, class_num):
    """Deterministic synthetic init (shapes match the PyTorch module).

    Stores both the raw f32 parameters (for the pure-JAX reference) and the
    128-padded bf16 weights / f32 biases consumed by the Pallas kernel.
    Zero padding keeps the math identical (padded rows/cols contribute 0).
    """
    output_dim = img_shape[0] * img_shape[1] * img_shape[2]
    dims = [z_size + class_num] + list(generator_layer_size) + [output_dim]
    dims_pad = [_round_up(d, 128) for d in dims]

    keys = jax.random.split(key, 2 * (len(dims) - 1) + 1)

    raw = {}
    # Embedding(class_num, class_num) ~ N(0, 1), like PyTorch's default.
    raw["label_emb"] = jax.random.normal(keys[0], (class_num, class_num),
                                         dtype=jnp.float32)
    for li in range(len(dims) - 1):
        fan_in, fan_out = dims[li], dims[li + 1]
        bound = 1.0 / (fan_in ** 0.5)
        # Stored transposed w.r.t. PyTorch (in_features, out_features) so the
        # kernel computes x @ W + b directly.
        raw[f"w{li + 1}"] = jax.random.uniform(
            keys[2 * li + 1], (fan_in, fan_out), dtype=jnp.float32,
            minval=-bound, maxval=bound)
        raw[f"b{li + 1}"] = jax.random.uniform(
            keys[2 * li + 2], (1, fan_out), dtype=jnp.float32,
            minval=-bound, maxval=bound)

    params = {"label_emb": raw["label_emb"], "raw": raw}
    for li in range(len(dims) - 1):
        w, b = raw[f"w{li + 1}"], raw[f"b{li + 1}"]
        w_pad = jnp.zeros((dims_pad[li], dims_pad[li + 1]), jnp.float32)
        w_pad = w_pad.at[:w.shape[0], :w.shape[1]].set(w)
        b_pad = jnp.zeros((1, dims_pad[li + 1]), jnp.float32)
        b_pad = b_pad.at[:, :b.shape[1]].set(b)
        params[f"w{li + 1}"] = w_pad.astype(jnp.bfloat16)   # bf16 MXU operand
        params[f"b{li + 1}"] = b_pad                         # f32 bias
    return params


def _pick_batch_tiling(B):
    """Batch tile (multiple of 16 rows for bf16 packing), capped at 1024 rows.

    For B > 16 the batch is split into at least two tiles so the 'parallel'
    grid axis has work for both v7x TensorCores; large batches get 1024-row
    tiles (per-row VMEM ~1.3 KB, so a tile is a few MiB double-buffered).
    """
    if B <= 16:
        tile_b = _round_up(max(B, 1), 16)
    else:
        tile_b = min(1024, _round_up(-(-B // 2), 16))
    b_pad = _round_up(B, tile_b)
    return tile_b, b_pad, b_pad // tile_b


def generator_forward(params, z, labels, z_size, img_shape):
    """Glue in plain JAX (embedding gather, concat, pad, reshape); MLP in Pallas."""
    z = z.reshape(-1, z_size)                                # z.view(-1, z_size)
    B = z.shape[0]
    class_num = params["label_emb"].shape[1]

    in_dim = z_size + class_num
    in_dim_pad = params["w1"].shape[0]
    out_dim = img_shape[0] * img_shape[1] * img_shape[2]
    out_dim_pad = params["w4"].shape[1]

    tile_b, b_pad, n_tiles = _pick_batch_tiling(B)

    # Build the lane/sublane-dense bf16 input slab directly (no f32 detour):
    # bf16 embedding gather + concat + zero-pad of batch and feature dims.
    z16 = z.astype(jnp.bfloat16)
    c16 = jnp.take(params["label_emb"], labels, axis=0).astype(jnp.bfloat16)
    x16 = jnp.concatenate([z16, c16], axis=1)                # torch.cat([z, c], 1)
    x_pad = jnp.pad(x16, ((0, b_pad - B), (0, in_dim_pad - in_dim)))

    def resident(arr):  # weights / biases: constant block index -> fetched once
        return pl.BlockSpec(arr.shape, lambda i: (0, 0))

    out_flat = pl.pallas_call(
        generator_mlp_kernel,
        out_shape=jax.ShapeDtypeStruct((b_pad, out_dim_pad), jnp.bfloat16),
        grid_spec=pl.GridSpec(
            grid=(n_tiles,),
            in_specs=[
                pl.BlockSpec((tile_b, in_dim_pad), lambda i: (i, 0)),
                resident(params["w1"]), resident(params["b1"]),
                resident(params["w2"]), resident(params["b2"]),
                resident(params["w3"]), resident(params["b3"]),
                resident(params["w4"]), resident(params["b4"]),
            ],
            out_specs=pl.BlockSpec((tile_b, out_dim_pad), lambda i: (i, 0)),
        ),
        compiler_params=pltpu.CompilerParams(
            dimension_semantics=("parallel",)),   # v7x dual-TC sharding
    )(x_pad,
      params["w1"], params["b1"],
      params["w2"], params["b2"],
      params["w3"], params["b3"],
      params["w4"], params["b4"])

    # Drop batch/feature padding, cast up, then the final NCHW view.
    out_flat = out_flat[:B, :out_dim].astype(jnp.float32)
    return out_flat.reshape(-1, *img_shape)                   # out.view(-1, *img_shape)


def generator_forward_ref(params, z, labels, z_size, img_shape,
                          use_kernel_numerics=False):
    """Pure-JAX reference.

    use_kernel_numerics=True mirrors the kernel's bf16-operand / f32-accumulate
    math (including the bf16 output cast); False is the plain f32
    PyTorch-equivalent forward.
    """
    raw = params["raw"]
    z = z.reshape(-1, z_size)
    c = jnp.take(raw["label_emb"], labels, axis=0)
    h = jnp.concatenate([z, c], axis=1).astype(jnp.float32)
    for li in range(1, 5):
        w, b = raw[f"w{li}"], raw[f"b{li}"]
        if use_kernel_numerics:
            h = jnp.dot(h.astype(jnp.bfloat16), w.astype(jnp.bfloat16),
                        preferred_element_type=jnp.float32) + b
        else:
            h = h @ w + b
        if li < 4:
            h = _leaky_relu(h)
    h = jnp.tanh(h)
    if use_kernel_numerics:
        h = h.astype(jnp.bfloat16).astype(jnp.float32)
    return h.reshape(-1, *img_shape)


if __name__ == "__main__":
    # Small, module-consistent shapes.
    batch = 2
    z_size = 32
    class_num = 8
    generator_layer_size = [64, 128, 256]
    img_shape = (1, 16, 16)   # C, H, W  -> output_dim = 256

    key = jax.random.PRNGKey(0)
    kp, kz, kl = jax.random.split(key, 3)

    params = make_generator_params(kp, generator_layer_size, z_size,
                                   img_shape, class_num)
    z = jax.random.normal(kz, (batch, z_size), dtype=jnp.float32)
    labels = jax.random.randint(kl, (batch,), 0, class_num, dtype=jnp.int32)

    out = generator_forward(params, z, labels, z_size, img_shape)
    out = jax.block_until_ready(out)

    ref_mirror = generator_forward_ref(params, z, labels, z_size, img_shape,
                                       use_kernel_numerics=True)
    ref_f32 = generator_forward_ref(params, z, labels, z_size, img_shape,
                                    use_kernel_numerics=False)

    assert out.shape == (batch, *img_shape), out.shape
    assert jnp.allclose(out, ref_mirror, atol=1e-2, rtol=1e-2), \
        "mismatch vs bf16-mirrored reference"
    assert jnp.allclose(out, ref_f32, atol=5e-2), \
        "mismatch vs f32 reference (bf16 drift too large)"

    print("KERNEL_OK")
</pallas_src>

<mosaic_0001>
module attributes {stable_mosaic.version = 11 : i64} {
  func.func @generator_mlp_kernel(%arg0: i32, %arg1: memref<16x128xbf16, #tpu.memory_space<vmem>>, %arg2: memref<128x128xbf16, #tpu.memory_space<vmem>>, %arg3: memref<1x128xf32, #tpu.memory_space<vmem>>, %arg4: memref<128x128xbf16, #tpu.memory_space<vmem>>, %arg5: memref<1x128xf32, #tpu.memory_space<vmem>>, %arg6: memref<128x256xbf16, #tpu.memory_space<vmem>>, %arg7: memref<1x256xf32, #tpu.memory_space<vmem>>, %arg8: memref<256x256xbf16, #tpu.memory_space<vmem>>, %arg9: memref<1x256xf32, #tpu.memory_space<vmem>>, %arg10: memref<16x256xbf16, #tpu.memory_space<vmem>>) attributes {dimension_semantics = [#tpu.dimension_semantics<parallel>], iteration_bounds = array<i64: 1>, scalar_prefetch = 0 : i64, scratch_operands = 0 : i64, tpu.core_type = #tpu.core_type<tc>, window_params = [{transform_indices = @transform_0, window_bounds = array<i64: 16, 128>}, {pipeline_mode = #tpu.pipeline_mode<synchronous>, transform_indices = @transform_1, window_bounds = array<i64: 128, 128>}, {pipeline_mode = #tpu.pipeline_mode<synchronous>, transform_indices = @transform_2, window_bounds = array<i64: 1, 128>}, {pipeline_mode = #tpu.pipeline_mode<synchronous>, transform_indices = @transform_3, window_bounds = array<i64: 128, 128>}, {pipeline_mode = #tpu.pipeline_mode<synchronous>, transform_indices = @transform_4, window_bounds = array<i64: 1, 128>}, {pipeline_mode = #tpu.pipeline_mode<synchronous>, transform_indices = @transform_5, window_bounds = array<i64: 128, 256>}, {pipeline_mode = #tpu.pipeline_mode<synchronous>, transform_indices = @transform_6, window_bounds = array<i64: 1, 256>}, {pipeline_mode = #tpu.pipeline_mode<synchronous>, transform_indices = @transform_7, window_bounds = array<i64: 256, 256>}, {pipeline_mode = #tpu.pipeline_mode<synchronous>, transform_indices = @transform_8, window_bounds = array<i64: 1, 256>}, {transform_indices = @transform_9, window_bounds = array<i64: 16, 256>}]} {
    %c0 = arith.constant 0 : index
    %c0_0 = arith.constant 0 : index
    %0 = vector.load %arg1[%c0, %c0_0] : memref<16x128xbf16, #tpu.memory_space<vmem>>, vector<16x128xbf16>
    %c0_1 = arith.constant 0 : index
    %c0_2 = arith.constant 0 : index
    %1 = vector.load %arg2[%c0_1, %c0_2] : memref<128x128xbf16, #tpu.memory_space<vmem>>, vector<128x128xbf16>
    %cst = arith.constant dense<0.000000e+00> : vector<16x128xf32>
    %2 = tpu.matmul %0, %1, %cst {dimension_numbers = #tpu.dot_dimension_numbers<[1], [0], [0], [1], [0, 0, 1, 1], [], []>} : vector<16x128xbf16>, vector<128x128xbf16>, vector<16x128xf32> -> vector<16x128xf32>
    %c0_3 = arith.constant 0 : index
    %c0_4 = arith.constant 0 : index
    %3 = vector.load %arg3[%c0_3, %c0_4] : memref<1x128xf32, #tpu.memory_space<vmem>>, vector<1x128xf32>
    %4 = vector.broadcast %3 : vector<1x128xf32> to vector<16x128xf32>
    %5 = arith.addf %2, %4 : vector<16x128xf32>
    %cst_5 = arith.constant 2.000000e-01 : f32
    %6 = vector.broadcast %cst_5 : f32 to vector<16x128xf32>
    %7 = arith.mulf %6, %5 : vector<16x128xf32>
    %8 = arith.maximumf %5, %7 : vector<16x128xf32>
    %9 = arith.truncf %8 : vector<16x128xf32> to vector<16x128xbf16>
    %c0_6 = arith.constant 0 : index
    %c0_7 = arith.constant 0 : index
    %10 = vector.load %arg4[%c0_6, %c0_7] : memref<128x128xbf16, #tpu.memory_space<vmem>>, vector<128x128xbf16>
    %cst_8 = arith.constant dense<0.000000e+00> : vector<16x128xf32>
    %11 = tpu.matmul %9, %10, %cst_8 {dimension_numbers = #tpu.dot_dimension_numbers<[1], [0], [0], [1], [0, 0, 1, 1], [], []>} : vector<16x128xbf16>, vector<128x128xbf16>, vector<16x128xf32> -> vector<16x128xf32>
    %c0_9 = arith.constant 0 : index
    %c0_10 = arith.constant 0 : index
    %12 = vector.load %arg5[%c0_9, %c0_10] : memref<1x128xf32, #tpu.memory_space<vmem>>, vector<1x128xf32>
    %13 = vector.broadcast %12 : vector<1x128xf32> to vector<16x128xf32>
    %14 = arith.addf %11, %13 : vector<16x128xf32>
    %cst_11 = arith.constant 2.000000e-01 : f32
    %15 = vector.broadcast %cst_11 : f32 to vector<16x128xf32>
    %16 = arith.mulf %15, %14 : vector<16x128xf32>
    %17 = arith.maximumf %14, %16 : vector<16x128xf32>
    %18 = arith.truncf %17 : vector<16x128xf32> to vector<16x128xbf16>
    %c0_12 = arith.constant 0 : index
    %c0_13 = arith.constant 0 : index
    %19 = vector.load %arg6[%c0_12, %c0_13] : memref<128x256xbf16, #tpu.memory_space<vmem>>, vector<128x256xbf16>
    %cst_14 = arith.constant dense<0.000000e+00> : vector<16x256xf32>
    %20 = tpu.matmul %18, %19, %cst_14 {dimension_numbers = #tpu.dot_dimension_numbers<[1], [0], [0], [1], [0, 0, 1, 1], [], []>} : vector<16x128xbf16>, vector<128x256xbf16>, vector<16x256xf32> -> vector<16x256xf32>
    %c0_15 = arith.constant 0 : index
    %c0_16 = arith.constant 0 : index
    %21 = vector.load %arg7[%c0_15, %c0_16] : memref<1x256xf32, #tpu.memory_space<vmem>>, vector<1x256xf32>
    %22 = vector.broadcast %21 : vector<1x256xf32> to vector<16x256xf32>
    %23 = arith.addf %20, %22 : vector<16x256xf32>
    %cst_17 = arith.constant 2.000000e-01 : f32
    %24 = vector.broadcast %cst_17 : f32 to vector<16x256xf32>
    %25 = arith.mulf %24, %23 : vector<16x256xf32>
    %26 = arith.maximumf %23, %25 : vector<16x256xf32>
    %27 = arith.truncf %26 : vector<16x256xf32> to vector<16x256xbf16>
    %c0_18 = arith.constant 0 : index
    %c0_19 = arith.constant 0 : index
    %28 = vector.load %arg8[%c0_18, %c0_19] : memref<256x256xbf16, #tpu.memory_space<vmem>>, vector<256x256xbf16>
    %cst_20 = arith.constant dense<0.000000e+00> : vector<16x256xf32>
    %29 = tpu.matmul %27, %28, %cst_20 {dimension_numbers = #tpu.dot_dimension_numbers<[1], [0], [0], [1], [0, 0, 1, 1], [], []>} : vector<16x256xbf16>, vector<256x256xbf16>, vector<16x256xf32> -> vector<16x256xf32>
    %c0_21 = arith.constant 0 : index
    %c0_22 = arith.constant 0 : index
    %30 = vector.load %arg9[%c0_21, %c0_22] : memref<1x256xf32, #tpu.memory_space<vmem>>, vector<1x256xf32>
    %31 = vector.broadcast %30 : vector<1x256xf32> to vector<16x256xf32>
    %32 = arith.addf %29, %31 : vector<16x256xf32>
    %33 = math.tanh %32 : vector<16x256xf32>
    %34 = arith.truncf %33 : vector<16x256xf32> to vector<16x256xbf16>
    %c0_23 = arith.constant 0 : index
    %c0_24 = arith.constant 0 : index
    %35 = vector.load %arg10[%c0_23, %c0_24] : memref<16x256xbf16, #tpu.memory_space<vmem>>, vector<16x256xbf16>
    tpu.vector_store %arg10[%c0_23, %c0_24], %34 {strides = array<i32>} : memref<16x256xbf16, #tpu.memory_space<vmem>>, vector<16x256xbf16>,
    return
  }
  func.func @transform_0(%arg0: i32) -> (i32, i32) {
    %c0_i32 = arith.constant 0 : i32
    %c0_i32_0 = arith.constant 0 : i32
    return %arg0, %c0_i32 : i32, i32
  }
  func.func @transform_1(%arg0: i32) -> (i32, i32) {
    %c0_i32 = arith.constant 0 : i32
    %c0_i32_0 = arith.constant 0 : i32
    %c0_i32_1 = arith.constant 0 : i32
    return %c0_i32, %c0_i32_0 : i32, i32
  }
  func.func @transform_2(%arg0: i32) -> (i32, i32) {
    %c0_i32 = arith.constant 0 : i32
    %c0_i32_0 = arith.constant 0 : i32
    %c0_i32_1 = arith.constant 0 : i32
    return %c0_i32, %c0_i32_0 : i32, i32
  }
  func.func @transform_3(%arg0: i32) -> (i32, i32) {
    %c0_i32 = arith.constant 0 : i32
    %c0_i32_0 = arith.constant 0 : i32
    %c0_i32_1 = arith.constant 0 : i32
    return %c0_i32, %c0_i32_0 : i32, i32
  }
  func.func @transform_4(%arg0: i32) -> (i32, i32) {
    %c0_i32 = arith.constant 0 : i32
    %c0_i32_0 = arith.constant 0 : i32
    %c0_i32_1 = arith.constant 0 : i32
    return %c0_i32, %c0_i32_0 : i32, i32
  }
  func.func @transform_5(%arg0: i32) -> (i32, i32) {
    %c0_i32 = arith.constant 0 : i32
    %c0_i32_0 = arith.constant 0 : i32
    %c0_i32_1 = arith.constant 0 : i32
    return %c0_i32, %c0_i32_0 : i32, i32
  }
  func.func @transform_6(%arg0: i32) -> (i32, i32) {
    %c0_i32 = arith.constant 0 : i32
    %c0_i32_0 = arith.constant 0 : i32
    %c0_i32_1 = arith.constant 0 : i32
    return %c0_i32, %c0_i32_0 : i32, i32
  }
  func.func @transform_7(%arg0: i32) -> (i32, i32) {
    %c0_i32 = arith.constant 0 : i32
    %c0_i32_0 = arith.constant 0 : i32
    %c0_i32_1 = arith.constant 0 : i32
    return %c0_i32, %c0_i32_0 : i32, i32
  }
  func.func @transform_8(%arg0: i32) -> (i32, i32) {
    %c0_i32 = arith.constant 0 : i32
    %c0_i32_0 = arith.constant 0 : i32
    %c0_i32_1 = arith.constant 0 : i32
    return %c0_i32, %c0_i32_0 : i32, i32
  }
  func.func @transform_9(%arg0: i32) -> (i32, i32) {
    %c0_i32 = arith.constant 0 : i32
    %c0_i32_0 = arith.constant 0 : i32
    return %arg0, %c0_i32 : i32, i32
  }
}

</mosaic_0001>

<bundles_post_ra>
// kernel: tpu_custom_call.1
= control target key start
LH: loop header
LB: loop body
LE: loop exit
PB: predicated region body
PF: predicated region fallthrough
CT: control target
= control target key end

     0   :  { %14 = vsyncpa [#allocation3], 0  ;;  %s1347_s0 = inlined_call_operand.hbm [shape: bf16[16,128], index: 0, kind: input, shape index: {}]   ;;  %s1348_s1 = inlined_call_operand.hbm [shape: bf16[128,128], index: 1, kind: input, shape index: {}]   ;;  %s1349_s2 = inlined_call_operand.vmem [shape: f32[1,128], index: 2, kind: input, shape index: {}]   ;;  %s1350_s3 = inlined_call_operand.hbm [shape: bf16[128,128], index: 3, kind: input, shape index: {}]   ;;  %s1351_s4 = inlined_call_operand.vmem [shape: f32[1,128], index: 4, kind: input, shape index: {}]   ;;  %s1352_s5 = inlined_call_operand.hbm [shape: bf16[128,256], index: 5, kind: input, shape index: {}]   ;;  %s1353_s6 = inlined_call_operand.vmem [shape: f32[1,256], index: 6, kind: input, shape index: {}]   ;;  %s1354_s7 = inlined_call_operand.hbm [shape: bf16[256,256], index: 7, kind: input, shape index: {}]   ;;  %s1355_s8 = inlined_call_operand.vmem [shape: f32[1,256], index: 8, kind: input, shape index: {}]   ;;  %s1356_s9 = inlined_call_operand.hbm [shape: bf16[16,256], index: 9, kind: output, shape index: {}]  }
   0x1   :  { %15 = vsyncpa [#allocation6], 0 }
   0x2   :  { %16 = vsyncpa [#allocation9], 0 }
   0x3   :  { %17 = vsyncpa [#allocation4], 0  ;;  %s1168_s30 = smov [#allocation5]   ;;  %s1169_s11 = smov [#allocation8]  }
   0x4   :  { %s35_s10 = sshll.u32 %s1168_s30, 4  ;;  %s63_s12 = sshll.u32 %s1169_s11, 4  ;;  %s36_s10 = int_to_ptr.vmem [resolvable:$true] %s35_s10  ;;  %s1231_s12 = int_to_ptr.vmem [resolvable:$true] %s63_s12 }
   0x5   :  { %s1028_s15 = scalar_lea.hbm %s1348_s1, 1024 }
   0x6   :  { %p1029_p0 = scmp.ne.s32.totalorder %s1348_s1, %s1028_s15  ;;  %p1032_p1 = scmp.lt.u32.totalorder %s1028_s15, %s1348_s1 }
   0x8   :  { %p1034_p2 = pnand %p1032_p1, %p1029_p0 }
   0xa   :  { %1037 = shalt.err (!%p1034_p2)
}
   0xb   :  { %s1038_s20 = scalar_lea.vmem %s36_s10, 1024  ;;  %p1043_p4 = scmp.lt.s32.totalorder %s36_s10, %s36_s10 }
   0xc   :  { %p1039_p3 = scmp.ne.s32.totalorder %s36_s10, %s1038_s20  ;;  %p1044_p5 = scmp.lt.s32.totalorder %s1038_s20, %s1038_s20 }
   0xe   :  { %p1045_p6 = por %p1044_p5, %p1043_p4 }
  0x10   :  { %p1046_p7 = pnand %p1045_p6, %p1039_p3 }
  0x12   :  { %1049 = shalt.err (!%p1046_p7)
}
  0x13   :  { %s1170_s21 = smov 64   ;;  %s1171_s22 = smov 4  }
  0x14   :  { %41 = dma.hbm_to_vmem [thread:$0]  %s1348_s1, 1024, %s36_s10, [#allocation6], %s1170_s21, %s1170_s21, %s1171_s22  }
  0x15   :  { %s1050_s27 = scalar_lea.hbm %s1352_s5, 2048 }
  0x16   :  { %p1051_p8 = scmp.ne.s32.totalorder %s1352_s5, %s1050_s27  ;;  %p1054_p9 = scmp.lt.u32.totalorder %s1050_s27, %s1352_s5 }
  0x18   :  { %p1056_p10 = pnand %p1054_p9, %p1051_p8 }
  0x1a   :  { %1059 = shalt.err (!%p1056_p10)
}
  0x1b   :  { %s1060_s13 = scalar_lea.vmem %s1231_s12, 2048  ;;  %p1065_p12 = scmp.lt.s32.totalorder %s1231_s12, %s1231_s12 }
  0x1c   :  { %p1061_p11 = scmp.ne.s32.totalorder %s1231_s12, %s1060_s13  ;;  %p1066_p13 = scmp.lt.s32.totalorder %s1060_s13, %s1060_s13 }
  0x1e   :  { %p1067_p0 = por %p1066_p13, %p1065_p12 }
  0x20   :  { %p1068_p1 = pnand %p1067_p0, %p1061_p11 }
  0x22   :  { %1071 = shalt.err (!%p1068_p1)
}
  0x23   :  { %s1172_s1 = smov 128   ;;  %s1173_s10 = smov 8  }
  0x24   :  { %69 = dma.hbm_to_vmem [thread:$0]  %s1352_s5, 2048, %s1231_s12, [#allocation9], %s1172_s1, %s1172_s1, %s1173_s10  }
  0x25   :  { %s1174_s16 = smov [#allocation2]   ;;  %s1175_s18 = smov [#allocation7]  }
  0x26   :  { %s23_s17 = sshll.u32 %s1174_s16, 4  ;;  %s49_s19 = sshll.u32 %s1175_s18, 4  ;;  %s24_s17 = int_to_ptr.vmem [resolvable:$true] %s23_s17  ;;  %s1268_s19 = int_to_ptr.vmem [resolvable:$true] %s49_s19 }
  0x27   :  { %s1072_s24 = scalar_lea.hbm %s1347_s0, 128 }
  0x28   :  { %p1073_p2 = scmp.ne.s32.totalorder %s1347_s0, %s1072_s24  ;;  %p1076_p3 = scmp.lt.u32.totalorder %s1072_s24, %s1347_s0 }
  0x2a   :  { %p1078_p4 = pnand %p1076_p3, %p1073_p2 }
  0x2c   :  { %1081 = shalt.err (!%p1078_p4)
}
  0x2d   :  { %s1082_s5 = scalar_lea.vmem %s24_s17, 128  ;;  %p1087_p6 = scmp.lt.s32.totalorder %s24_s17, %s24_s17 }
  0x2e   :  { %p1083_p5 = scmp.ne.s32.totalorder %s24_s17, %s1082_s5  ;;  %p1088_p7 = scmp.lt.s32.totalorder %s1082_s5, %s1082_s5 }
  0x30   :  { %p1089_p8 = por %p1088_p7, %p1087_p6 }
  0x32   :  { %p1090_p9 = pnand %p1089_p8, %p1083_p5 }
  0x34   :  { %1093 = shalt.err (!%p1090_p9)
}
  0x35   :  { %29 = dma.hbm_to_vmem [thread:$0]  %s1347_s0, 128, %s24_s17, [#allocation3], %s1170_s21, %s1170_s21, %s1171_s22  }
  0x36   :  { %s1094_s13 = scalar_lea.hbm %s1350_s3, 1024 }
  0x37   :  { %p1095_p10 = scmp.ne.s32.totalorder %s1350_s3, %s1094_s13  ;;  %p1098_p11 = scmp.lt.u32.totalorder %s1094_s13, %s1350_s3 }
  0x39   :  { %p1100_p12 = pnand %p1098_p11, %p1095_p10 }
  0x3b   :  { %1103 = shalt.err (!%p1100_p12)
}
  0x3c   :  { %s1104_s20 = scalar_lea.vmem %s1268_s19, 1024  ;;  %p1109_p0 = scmp.lt.s32.totalorder %s1268_s19, %s1268_s19 }
  0x3d   :  { %p1105_p13 = scmp.ne.s32.totalorder %s1268_s19, %s1104_s20  ;;  %p1110_p1 = scmp.lt.s32.totalorder %s1104_s20, %s1104_s20 }
  0x3f   :  { %p1111_p2 = por %p1110_p1, %p1109_p0 }
  0x41   :  { %p1112_p3 = pnand %p1111_p2, %p1105_p13 }
  0x43   :  { %1115 = shalt.err (!%p1112_p3)
}
  0x44   :  { %55 = dma.hbm_to_vmem [thread:$0]  %s1350_s3, 1024, %s1268_s19, [#allocation6], %s1170_s21, %s1170_s21, %s1171_s22  }
  0x45   :  { %s1176_s23 = smov [#allocation10]   ;;  %s1116_s27 = scalar_lea.hbm %s1354_s7, 4096 }
  0x46   :  { %s77_s24 = sshll.u32 %s1176_s23, 4  ;;  %p1117_p4 = scmp.ne.s32.totalorder %s1354_s7, %s1116_s27  ;;  %s78_s24 = int_to_ptr.vmem [resolvable:$true] %s77_s24 }
  0x47   :  { %p1120_p5 = scmp.lt.u32.totalorder %s1116_s27, %s1354_s7 }
  0x49   :  { %p1122_p6 = pnand %p1120_p5, %p1117_p4 }
  0x4b   :  { %1125 = shalt.err (!%p1122_p6)
}
  0x4c   :  { %s1126_s30 = scalar_lea.vmem %s78_s24, 4096  ;;  %p1131_p8 = scmp.lt.s32.totalorder %s78_s24, %s78_s24 }
  0x4d   :  { %p1127_p7 = scmp.ne.s32.totalorder %s78_s24, %s1126_s30  ;;  %p1132_p9 = scmp.lt.s32.totalorder %s1126_s30, %s1126_s30 }
  0x4f   :  { %p1133_p10 = por %p1132_p9, %p1131_p8 }
  0x51   :  { %p1134_p11 = pnand %p1133_p10, %p1127_p7 }
  0x53   :  { %1137 = shalt.err (!%p1134_p11)
}
  0x54   :  { %83 = dma.hbm_to_vmem [thread:$0]  %s1354_s7, 4096, %s78_s24, [#allocation9], %s1172_s1, %s1172_s1, %s1173_s10  }
  0x55   :  { %1160 = dma.done.wait [#allocation3], 128  }
  0x56   :  { %1161 = vsyncadd [#allocation3], 4294967168 }
  0x57   :  { %1162 = dma.done.wait [#allocation6], 2048  }
  0x58   :  { %1163 = vsyncadd [#allocation6], 4294965248 }
  0x59   :  { %1164 = dma.done.wait [#allocation9], 6144  }
  0x5a   :  { %1165 = vsyncadd [#allocation9], 4294961152  ;;  %v1177_v0 = vmov 0.0   ;;  %vm1178_vm0 = vmmov 0   ;;  %v931_v1 = vld [vmem:[#allocation5] sm:$0xff]   ;;  %v932_v2 = vld [vmem:[#allocation5 + $0x8] sm:$0xff]  }
  0x5b   :  { %878 = vmatprep.subr.bf16.mxu0 %v1177_v0  ;;  %894 = vmatprep.mubr.msk.bf16.mxu0 %vm1178_vm0, %v1177_v0  ;;  %v933_v3 = vld [vmem:[#allocation5 + $0x10] sm:$0xff]   ;;  %v940_v4 = vld [vmem:[#allocation7] sm:$0xff]   ;;  %v934_v5 = vld [vmem:[#allocation5 + $0x18] sm:$0xff]   ;;  %v1179_v46 = vmov 0   ;;  %s1180_s14 = smov [#allocation11]  }
  0x5c   :  { %898 = vmatprep.subr.bf16.mxu1 %v1177_v0  ;;  %914 = vmatprep.mubr.msk.bf16.mxu1 %vm1178_vm0, %v1177_v0  ;;  %v941_v6 = vld [vmem:[#allocation7 + $0x8] sm:$0xff]   ;;  %v935_v7 = vld [vmem:[#allocation5 + $0x20] sm:$0xff]   ;;  %v942_v8 = vld [vmem:[#allocation7 + $0x10] sm:$0xff]   ;;  %s775_s15 = sshll.u32 %s1180_s14, 4  ;;  %s776_s15 = int_to_ptr.vmem [resolvable:$true] %s775_s15 }
  0x5d   :  { %879 = vmatpush3.bf16.msra.mxu0 %v931_v1  ;;  %899 = vmatpush3.bf16.msra.mxu1 %v940_v4  ;;  %v936_v9 = vld [vmem:[#allocation5 + $0x28] sm:$0xff]   ;;  %v943_v10 = vld [vmem:[#allocation7 + $0x18] sm:$0xff]   ;;  %v937_v11 = vld [vmem:[#allocation5 + $0x30] sm:$0xff]   ;;  %p1143_p13 = scmp.lt.s32.totalorder %s776_s15, %s776_s15 }
  0x5e   :  { %880 = vmatprep.subr.bf16.mxu0 %v1177_v0  ;;  %900 = vmatprep.subr.bf16.mxu1 %v1177_v0  ;;  %v944_v12 = vld [vmem:[#allocation7 + $0x20] sm:$0xff]   ;;  %v938_v13 = vld [vmem:[#allocation5 + $0x38] sm:$0xff]   ;;  %v945_v15 = vld [vmem:[#allocation7 + $0x28] sm:$0xff]  }
  0x5f   :  { %v939_v14 = vld [vmem:[#allocation2] sm:$0xff]   ;;  %v946_v16 = vld [vmem:[#allocation7 + $0x30] sm:$0xff]   ;;  %v948_v18 = vld [vmem:[#allocation8] ss:$8 sps:$4 sm:$0xff]  }
  0x60   :  { %v947_v17 = vld [vmem:[#allocation7 + $0x38] sm:$0xff]   ;;  %v950_v19 = vld [vmem:[#allocation8 + $0x4] ss:$8 sps:$4 sm:$0xff]   ;;  %v954_v23 = vld [vmem:[#allocation8 + $0x20] ss:$8 sps:$4 sm:$0xff]  }
  0x61   :  { %881 = vmatpush3.bf16.msra.mxu0 %v932_v2  ;;  %901 = vmatpush3.bf16.msra.mxu1 %v941_v6  ;;  %v953_v20 = vld [vmem:[#allocation8 + $0x14] ss:$8 sps:$4 sm:$0xff]   ;;  %v951_v21 = vld [vmem:[#allocation8 + $0x10] ss:$8 sps:$4 sm:$0xff]   ;;  %v956_v22 = vld [vmem:[#allocation8 + $0x24] ss:$8 sps:$4 sm:$0xff]  }
  0x62   :  { %882 = vmatprep.subr.bf16.mxu0 %v1177_v0  ;;  %902 = vmatprep.subr.bf16.mxu1 %v1177_v0  ;;  %v959_v24 = vld [vmem:[#allocation8 + $0x34] ss:$8 sps:$4 sm:$0xff]   ;;  %v957_v25 = vld [vmem:[#allocation8 + $0x30] ss:$8 sps:$4 sm:$0xff]   ;;  %v962_v26 = vld [vmem:[#allocation8 + $0x44] ss:$8 sps:$4 sm:$0xff]  }
  0x63   :  { %v960_v27 = vld [vmem:[#allocation8 + $0x40] ss:$8 sps:$4 sm:$0xff]   ;;  %v965_v28 = vld [vmem:[#allocation8 + $0x54] ss:$8 sps:$4 sm:$0xff]   ;;  %v963_v29 = vld [vmem:[#allocation8 + $0x50] ss:$8 sps:$4 sm:$0xff]  }
  0x64   :  { %v789_v30 = vld [vmem:[%s1349_s2] ss:$0 sm:$0xff]  ;;  %v968_v42 = vld [vmem:[#allocation8 + $0x64] ss:$8 sps:$4 sm:$0xff]   ;;  %v966_v43 = vld [vmem:[#allocation8 + $0x60] ss:$8 sps:$4 sm:$0xff]  }
  0x65   :  { %883 = vmatpush3.bf16.msra.mxu0 %v933_v3  ;;  %903 = vmatpush3.bf16.msra.mxu1 %v942_v8  ;;  %v971_v44 = vld [vmem:[#allocation8 + $0x74] ss:$8 sps:$4 sm:$0xff]   ;;  %v969_v45 = vld [vmem:[#allocation8 + $0x70] ss:$8 sps:$4 sm:$0xff]   ;;  %v972_v47 = vld [vmem:[#allocation10] ss:$8 sps:$4 sm:$0xff]  }
  0x66   :  { %884 = vmatprep.subr.bf16.mxu0 %v1177_v0  ;;  %904 = vmatprep.subr.bf16.mxu1 %v1177_v0  ;;  %v974_v48 = vld [vmem:[#allocation10 + $0x4] ss:$8 sps:$4 sm:$0xff]   ;;  %v977_v49 = vld [vmem:[#allocation10 + $0x14] ss:$8 sps:$4 sm:$0xff]   ;;  %v975_v50 = vld [vmem:[#allocation10 + $0x10] ss:$8 sps:$4 sm:$0xff]  }
  0x67   :  { %v980_v51 = vld [vmem:[#allocation10 + $0x24] ss:$8 sps:$4 sm:$0xff]   ;;  %v978_v52 = vld [vmem:[#allocation10 + $0x20] ss:$8 sps:$4 sm:$0xff]   ;;  %v983_v53 = vld [vmem:[#allocation10 + $0x34] ss:$8 sps:$4 sm:$0xff]  }
  0x68   :  { %v981_v54 = vld [vmem:[#allocation10 + $0x30] ss:$8 sps:$4 sm:$0xff]   ;;  %v986_v55 = vld [vmem:[#allocation10 + $0x44] ss:$8 sps:$4 sm:$0xff]   ;;  %v984_v56 = vld [vmem:[#allocation10 + $0x40] ss:$8 sps:$4 sm:$0xff]  }
  0x69   :  { %885 = vmatpush3.bf16.msra.mxu0 %v934_v5  ;;  %905 = vmatpush3.bf16.msra.mxu1 %v943_v10  ;;  %v989_v57 = vld [vmem:[#allocation10 + $0x54] ss:$8 sps:$4 sm:$0xff]   ;;  %v987_v58 = vld [vmem:[#allocation10 + $0x50] ss:$8 sps:$4 sm:$0xff]   ;;  %v992_v59 = vld [vmem:[#allocation10 + $0x64] ss:$8 sps:$4 sm:$0xff]  }
  0x6a   :  { %886 = vmatprep.subr.bf16.mxu0 %v1177_v0  ;;  %906 = vmatprep.subr.bf16.mxu1 %v1177_v0  ;;  %v990_v60 = vld [vmem:[#allocation10 + $0x60] ss:$8 sps:$4 sm:$0xff]   ;;  %v995_v61 = vld [vmem:[#allocation10 + $0x74] ss:$8 sps:$4 sm:$0xff]   ;;  %v993_v62 = vld [vmem:[#allocation10 + $0x70] ss:$8 sps:$4 sm:$0xff]  }
  0x6b   :  { %v998_v63 = vld [vmem:[#allocation10 + $0x84] ss:$8 sps:$4 sm:$0xff]   ;;  %v1001_v1 = vld [vmem:[#allocation10 + $0x94] ss:$8 sps:$4 sm:$0xff]   ;;  %v999_v2 = vld [vmem:[#allocation10 + $0x90] ss:$8 sps:$4 sm:$0xff]  }
  0x6c   :  { %v1004_v3 = vld [vmem:[#allocation10 + $0xa4] ss:$8 sps:$4 sm:$0xff]   ;;  %v1002_v4 = vld [vmem:[#allocation10 + $0xa0] ss:$8 sps:$4 sm:$0xff]   ;;  %v1007_v5 = vld [vmem:[#allocation10 + $0xb4] ss:$8 sps:$4 sm:$0xff]  }
  0x6d   :  { %887 = vmatpush3.bf16.msra.mxu0 %v935_v7  ;;  %907 = vmatpush3.bf16.msra.mxu1 %v944_v12  ;;  %v1005_v6 = vld [vmem:[#allocation10 + $0xb0] ss:$8 sps:$4 sm:$0xff]   ;;  %v1010_v7 = vld [vmem:[#allocation10 + $0xc4] ss:$8 sps:$4 sm:$0xff]   ;;  %v1008_v8 = vld [vmem:[#allocation10 + $0xc0] ss:$8 sps:$4 sm:$0xff]  }
  0x6e   :  { %888 = vmatprep.subr.bf16.mxu0 %v1177_v0  ;;  %908 = vmatprep.subr.bf16.mxu1 %v1177_v0 }
  0x71   :  { %889 = vmatpush3.bf16.msra.mxu0 %v936_v9  ;;  %909 = vmatpush3.bf16.msra.mxu1 %v945_v15  ;;  %v799_v9 = vld [vmem:[%s1351_s4] ss:$0 sm:$0xff] }
  0x72   :  { %890 = vmatprep.subr.bf16.mxu0 %v1177_v0  ;;  %910 = vmatprep.subr.bf16.mxu1 %v1177_v0 }
  0x75   :  { %891 = vmatpush3.bf16.msra.mxu0 %v937_v11  ;;  %911 = vmatpush3.bf16.msra.mxu1 %v946_v16 }
  0x76   :  { %892 = vmatprep.subr.bf16.mxu0 %v1177_v0  ;;  %912 = vmatprep.subr.bf16.mxu1 %v1177_v0  ;;  %v996_v0 = vld [vmem:[#allocation10 + $0x80] ss:$8 sps:$4 sm:$0xff]  }
  0x79   :  { %893 = vmatpush3.bf16.msra.mxu0 %v938_v13  ;;  %913 = vmatpush3.bf16.msra.mxu1 %v947_v17 }
  0x7a   :  { %452 = vmatprep.subr.bf16.mxu0 %v950_v19  ;;  %709 = vmatprep.subr.bf16.mxu1 %v974_v48 }
  0x7c   :  { %895 = vmatmul.mubr.bf16.vlgmr.msra.gmra.mrb[0].mxu0 %v939_v14 }
  0x7d   :  { %453 = vmatpush1.bf16.msra.mxu0 %v948_v18  ;;  %484 = vmatprep.mubr.bf16.mxu0 %v1179_v46 }
  0x7e   :  { %454 = vmatprep.subr.bf16.mxu0 %v953_v20 }
  0x81   :  { %455 = vmatpush1.bf16.msra.mxu0 %v951_v21  ;;  %v1013_v21 = vld [vmem:[#allocation10 + $0xd4] ss:$8 sps:$4 sm:$0xff]  }
  0x82   :  { %456 = vmatprep.subr.bf16.mxu0 %v956_v22  ;;  %v1011_v22 = vld [vmem:[#allocation10 + $0xd0] ss:$8 sps:$4 sm:$0xff]  }
  0x85   :  { %457 = vmatpush1.bf16.msra.mxu0 %v954_v23  ;;  %v1016_v23 = vld [vmem:[#allocation10 + $0xe4] ss:$8 sps:$4 sm:$0xff]  }
  0x86   :  { %458 = vmatprep.subr.bf16.mxu0 %v959_v24  ;;  %v1014_v24 = vld [vmem:[#allocation10 + $0xe0] ss:$8 sps:$4 sm:$0xff]  }
  0x89   :  { %459 = vmatpush1.bf16.msra.mxu0 %v957_v25  ;;  %v1019_v25 = vld [vmem:[#allocation10 + $0xf4] ss:$8 sps:$4 sm:$0xff]  }
  0x8a   :  { %460 = vmatprep.subr.bf16.mxu0 %v962_v26  ;;  %v1017_v26 = vld [vmem:[#allocation10 + $0xf0] ss:$8 sps:$4 sm:$0xff]  }
  0x8d   :  { %461 = vmatpush1.bf16.msra.mxu0 %v960_v27  ;;  %v362_v27 = vlaneseq }
  0x8e   :  { %462 = vmatprep.subr.bf16.mxu0 %v965_v28 }
  0x8f   :  { %v363_v28 = vshrl.u32 %v362_v27, 7 }
  0x91   :  { %463 = vmatpush1.bf16.msra.mxu0 %v963_v29  ;;  %v364_v29 = vsub.s32 0, %v363_v28 }
  0x92   :  { %464 = vmatprep.subr.bf16.mxu0 %v968_v42 }
  0x95   :  { %465 = vmatpush1.bf16.msra.mxu0 %v966_v43 }
  0x96   :  { %466 = vmatprep.subr.bf16.mxu0 %v971_v44 }
  0x99   :  { %467 = vmatpush1.bf16.msra.mxu0 %v969_v45 }
 0x14f   :  { %v215_v31 = vpop.f32.mrb[0].mxu0 }
 0x150   :  { %v216_v32 = vadd.f32 %v789_v30, %v215_v31  ;;  %v896_v33 = vpop.f32.mrb[1].mxu0  ;;  %v368_v31 = vsub.s32 1, %v363_v28 }
 0x151   :  { %v218_v34 = vpop.f32.mrb[2].mxu0 }
 0x152   :  { %v222_v35 = vmul.f32 0.2, %v216_v32  ;;  %v219_v36 = vadd.f32 %v789_v30, %v218_v34  ;;  %v897_v37 = vpop.f32.mrb[3].mxu0  ;;  %v360_v30 = vld [vmem:[%s1353_s6] sm:$0x3] }
 0x153   :  { %v369_v33 = vrot.slane %v360_v30, %v368_v31 }
 0x154   :  { %v223_v38 = vmul.f32 0.2, %v219_v36  ;;  %v224_v39 = vmax.f32 %v216_v32, %v222_v35  ;;  %v365_v32 = vrot.slane %v360_v30, %v364_v29 }
 0x156   :  { %v225_v40 = vmax.f32 %v219_v36, %v223_v38 }
 0x158   :  { %v226_v41 = vpack.c.bf16 %v225_v40, %v224_v39 }
 0x15a   :  { %915 = vmatmul.mubr.bf16.vlgmr.msra.gmra.mrb[0].mxu1 %v226_v41 }
 0x15b   :  { %710 = vmatpush1.bf16.msra.mxu1 %v972_v47 }
 0x15c   :  { %711 = vmatprep.subr.bf16.mxu1 %v977_v49 }
 0x15f   :  { %712 = vmatpush1.bf16.msra.mxu1 %v975_v50 }
 0x160   :  { %713 = vmatprep.subr.bf16.mxu1 %v980_v51 }
 0x163   :  { %714 = vmatpush1.bf16.msra.mxu1 %v978_v52  ;;  %v537_v52 = vld [vmem:[%s1355_s8] sm:$0x3]  ;;  %s1138_s8 = scalar_lea.vmem %s776_s15, 256 }
 0x164   :  { %715 = vmatprep.subr.bf16.mxu1 %v983_v53  ;;  %v542_v53 = vrot.slane %v537_v52, %v364_v29  ;;  %p1139_p12 = scmp.ne.s32.totalorder %s776_s15, %s1138_s8  ;;  %p1144_p0 = scmp.lt.s32.totalorder %s1138_s8, %s1138_s8 }
 0x166   :  { %p1145_p1 = por %p1144_p0, %p1143_p13 }
 0x167   :  { %716 = vmatpush1.bf16.msra.mxu1 %v981_v54  ;;  %v546_v54 = vrot.slane %v537_v52, %v368_v31 }
 0x168   :  { %717 = vmatprep.subr.bf16.mxu1 %v986_v55  ;;  %p1146_p2 = pnand %p1145_p1, %p1139_p12 }
 0x16b   :  { %718 = vmatpush1.bf16.msra.mxu1 %v984_v56 }
 0x16c   :  { %719 = vmatprep.subr.bf16.mxu1 %v989_v57 }
 0x16f   :  { %720 = vmatpush1.bf16.msra.mxu1 %v987_v58 }
 0x170   :  { %721 = vmatprep.subr.bf16.mxu1 %v992_v59 }
 0x173   :  { %722 = vmatpush1.bf16.msra.mxu1 %v990_v60 }
 0x174   :  { %723 = vmatprep.subr.bf16.mxu1 %v995_v61 }
 0x177   :  { %724 = vmatpush1.bf16.msra.mxu1 %v993_v62 }
 0x178   :  { %725 = vmatprep.subr.bf16.mxu1 %v998_v63 }
 0x17b   :  { %726 = vmatpush1.bf16.msra.mxu1 %v996_v0 }
 0x17c   :  { %727 = vmatprep.subr.bf16.mxu1 %v1001_v1 }
 0x17f   :  { %728 = vmatpush1.bf16.msra.mxu1 %v999_v2 }
 0x180   :  { %729 = vmatprep.subr.bf16.mxu1 %v1004_v3 }
 0x183   :  { %730 = vmatpush1.bf16.msra.mxu1 %v1002_v4 }
 0x184   :  { %731 = vmatprep.subr.bf16.mxu1 %v1007_v5 }
 0x187   :  { %732 = vmatpush1.bf16.msra.mxu1 %v1005_v6 }
 0x188   :  { %733 = vmatprep.subr.bf16.mxu1 %v1010_v7 }
 0x18b   :  { %734 = vmatpush1.bf16.msra.mxu1 %v1008_v8 }
 0x18c   :  { %735 = vmatprep.subr.bf16.mxu1 %v1013_v21 }
 0x18f   :  { %736 = vmatpush1.bf16.msra.mxu1 %v1011_v22 }
 0x190   :  { %737 = vmatprep.subr.bf16.mxu1 %v1016_v23 }
 0x193   :  { %738 = vmatpush1.bf16.msra.mxu1 %v1014_v24 }
 0x194   :  { %739 = vmatprep.subr.bf16.mxu1 %v1019_v25 }
 0x197   :  { %740 = vmatpush1.bf16.msra.mxu1 %v1017_v26 }
 0x22d   :  { %v332_v10 = vpop.f32.mrb[0].mxu1 }
 0x22e   :  { %v333_v11 = vadd.f32 %v799_v9, %v332_v10  ;;  %v916_v12 = vpop.f32.mrb[1].mxu1 }
 0x22f   :  { %v335_v13 = vpop.f32.mrb[2].mxu1 }
 0x230   :  { %v339_v14 = vmul.f32 0.2, %v333_v11  ;;  %v336_v15 = vadd.f32 %v799_v9, %v335_v13  ;;  %v917_v16 = vpop.f32.mrb[3].mxu1 }
 0x232   :  { %v340_v17 = vmul.f32 0.2, %v336_v15  ;;  %v341_v18 = vmax.f32 %v333_v11, %v339_v14 }
 0x234   :  { %v342_v19 = vmax.f32 %v336_v15, %v340_v17 }
 0x236   :  { %v343_v20 = vpack.c.bf16 %v342_v19, %v341_v18 }
 0x238   :  { %485 = vmatmul.mubr.bf16.vlgmr.msra.gmra.mrb[4].mxu0 %v343_v20 }
 0x30b   :  { %v486_v34 = vpop.f32.mrb[4].mxu0 }
 0x30c   :  { %v487_v35 = vadd.f32 %v486_v34, %v365_v32  ;;  %v488_v36 = vpop.f32.mrb[5].mxu0 }
 0x30d   :  { %v489_v37 = vadd.f32 %v488_v36, %v369_v33  ;;  %v490_v38 = vpop.f32.mrb[6].mxu0 }
 0x30e   :  { %v495_v39 = vmul.f32 0.2, %v487_v35  ;;  %v491_v40 = vadd.f32 %v490_v38, %v365_v32  ;;  %v492_v41 = vpop.f32.mrb[7].mxu0 }
 0x30f   :  { %v496_v42 = vmul.f32 0.2, %v489_v37  ;;  %v493_v43 = vadd.f32 %v492_v41, %v369_v33 }
 0x310   :  { %v497_v44 = vmul.f32 0.2, %v491_v40  ;;  %v499_v46 = vmax.f32 %v487_v35, %v495_v39 }
 0x311   :  { %v498_v45 = vmul.f32 0.2, %v493_v43  ;;  %v500_v48 = vmax.f32 %v489_v37, %v496_v42 }
 0x312   :  { %v501_v47 = vmax.f32 %v491_v40, %v497_v44 }
 0x313   :  { %v502_v49 = vmax.f32 %v493_v43, %v498_v45 }
 0x314   :  { %v503_v50 = vpack.c.bf16 %v501_v47, %v499_v46 }
 0x315   :  { %v504_v51 = vpack.c.bf16 %v502_v49, %v500_v48 }
 0x317   :  { %741 = vmatprep.mubr.bf16.mxu1 %v504_v51 }
 0x318   :  { %742 = vmatmul.mubr.bf16.vlgmr.msra.gmra.mrb[4].mxu1 %v503_v50 }
 0x3eb   :  { %v743_v55 = vpop.f32.mrb[4].mxu1 }
 0x3ec   :  { %v744_v56 = vadd.f32 %v743_v55, %v542_v53  ;;  %v745_v57 = vpop.f32.mrb[5].mxu1 }
 0x3ed   :  { %v746_v58 = vadd.f32 %v745_v57, %v546_v54  ;;  %v747_v59 = vpop.f32.mrb[6].mxu1 }
 0x3ee   :  { %1020 = vtanh.f32 %v744_v56  ;;  %v748_v60 = vadd.f32 %v747_v59, %v542_v53  ;;  %v749_v61 = vpop.f32.mrb[7].mxu1 }
 0x3ef   :  { %1022 = vtanh.f32 %v746_v58  ;;  %v750_v62 = vadd.f32 %v749_v61, %v546_v54 }
 0x3f0   :  { %1024 = vtanh.f32 %v748_v60 }
 0x3f1   :  { %1026 = vtanh.f32 %v750_v62 }
 0x3f8   :  { %v1021_v63 = vpop.eup %1020 }
 0x3f9   :  { %v1023_v0 = vpop.eup %1022 }
 0x3fa   :  { %v1025_v1 = vpop.eup %1024  ;;  %v858_v2 = vpack.c.bf16 %v1023_v0, %v1021_v63 }
 0x3fb   :  { %v1027_v3 = vpop.eup %1026 }
 0x3fc   :  { %v859_v4 = vpack.c.bf16 %v1027_v3, %v1025_v1  ;;  %768 = vst [vmem:[#allocation11] sm:$0xff] %v858_v2 }
 0x3fe   :  { %769 = vst [vmem:[#allocation11 + $0x8] sm:$0xff] %v859_v4 }
 0x3ff   :  { %1149 = shalt.err (!%p1146_p2)
}
 0x400   :  { %s1150_s20 = scalar_lea.hbm %s1356_s9, 256 }
 0x401   :  { %p1151_p3 = scmp.ne.s32.totalorder %s1356_s9, %s1150_s20  ;;  %p1154_p4 = scmp.lt.u32.totalorder %s1150_s20, %s1356_s9 }
 0x403   :  { %p1156_p5 = pnand %p1154_p4, %p1151_p3 }
 0x405   :  { %1159 = shalt.err (!%p1156_p5)
}
 0x406   :  { %781 = dma.vmem_to_hbm [thread:$0]  %s776_s15, 256, %s1356_s9, [#allocation4], %s1172_s1, %s1172_s1, %s1173_s10  }
 0x407   :  { %1166 = dma.done.wait [#allocation4], 256  }
 0x408   :  { %1167 = vsyncadd [#allocation4], 4294967040 }
 0x409   :  { %785 = vsyncpa [#allocation3], 1 }
 0x40a   :  { %786 = vsyncpa [#allocation6], 1 }
 0x40b   :  { %787 = vsyncpa [#allocation9], 1 }
 0x40c   :  { %788 = vsyncpa [#allocation4], 1 }

</bundles_post_ra>
